<compile_context>
chip_gen: v6e
topology: v6e:2x2x1
jax: 0.10.0
libtpu: 0.0.40
codegen_flags: <defaults>
</compile_context>

<pallas_src>
import jax
import jax.numpy as jnp
from jax import lax
from jax.experimental import pallas as pl
from jax.experimental.pallas import tpu as pltpu

# ---------------- configuration (small, consistent with the module) ----------
T = 8              # decoder time steps per streaming chunk
F = 32             # acoustic feature dim
V = 128            # unit vocabulary size (lane-dense)
E = 32             # unit embedding dim
R = 3              # int(round(expand_factor=3.0)) frames per unit
HOP = 128          # wav samples per frame
OUTPUT_LEN = 1280  # module default output_len
NF = (OUTPUT_LEN + HOP - 1) // HOP   # 10 — only frames that reach the output


# ---------------- fused kernel: decoder -> unique_consecutive -> vocoder -----
def streamer_kernel(x_ref, wdec_ref, bdec_ref, emb_ref, wvoc_ref, wav_ref):
    # ---- 1) decoder.infer stand-in: greedy unit ids --------------------------
    # TODO(synk): RNN-T beam search over an external preloaded model has no
    #             Pallas equivalent; replaced by a greedy projection decoder.
    logits = jnp.dot(x_ref[...], wdec_ref[...],
                     preferred_element_type=jnp.float32) + bdec_ref[...]      # [T, V] f32
    iota_v = lax.broadcasted_iota(jnp.int32, (T, V), 1)
    m = jnp.max(logits, axis=-1, keepdims=True)                               # [T, 1]
    ids = jnp.min(jnp.where(logits == m, iota_v, V),
                  axis=-1, keepdims=True)                                     # [T, 1] first argmax

    ids_f = jnp.broadcast_to(ids, (T, V)).astype(jnp.float32)                 # id, lane-broadcast
    onehot_t = (iota_v == ids).astype(jnp.float32)                            # [T, V] one-hot(id)

    # ---- 2) torch.unique_consecutive: keep mask + stable compaction ----------
    # keep[t] = (t == 0) | (ids[t] != ids[t-1]);  dest[t] = (# kept in [0..t]) - 1.
    # Shifted-compare and inclusive prefix sum via tiny [T,T]x[T,V] matmuls:
    # unambiguous lowering, no argsort / cumsum / roll, ids stay on-chip.
    row = lax.broadcasted_iota(jnp.int32, (T, T), 0)
    col = lax.broadcasted_iota(jnp.int32, (T, T), 1)
    shift_mat = (col == row - 1).astype(jnp.float32)        # row t selects t-1 (row 0 = zeros)
    ltri = (col <= row).astype(jnp.float32)                 # inclusive prefix-sum matrix

    t_iota = lax.broadcasted_iota(jnp.int32, (T, V), 0)
    ids_prev = jnp.dot(shift_mat, ids_f, preferred_element_type=jnp.float32)  # ids[t-1]
    keep_f = jnp.logical_or(t_iota == 0,
                            ids_f != ids_prev).astype(jnp.float32)            # [T, V]
    dest = jnp.dot(ltri, keep_f, preferred_element_type=jnp.float32) - 1.0    # compacted slot

    # ---- 3) expand each kept unit to R frames (only NF frames reach output) --
    # Frame f uses compacted unit f // R, i.e. f in [R*dest[t], R*dest[t] + R).
    f_col = lax.broadcasted_iota(jnp.int32, (NF, V), 0).astype(jnp.float32)   # frame idx / row
    lo = R * dest                                                             # [T, V]
    frame_onehot = jnp.zeros((NF, V), jnp.float32)
    for t in range(T):  # static unroll (T = 8), pure VPU work on [NF, 128] tiles
        in_range = jnp.logical_and(f_col >= lo[t:t + 1, :],
                                   f_col < lo[t:t + 1, :] + R)
        sel = keep_f[t:t + 1, :] * in_range.astype(jnp.float32)               # [NF, V]
        frame_onehot = frame_onehot + sel * onehot_t[t:t + 1, :]

    # ---- 4) vocoder.synthesize_v2 stand-in: embed -> tanh -> project ---------
    # TODO(synk): the HiFi-GAN duration synthesizer is an external checkpoint;
    #             replaced by an embedding + linear projection synthesizer.
    h = jnp.tanh(jnp.dot(frame_onehot.astype(jnp.bfloat16), emb_ref[...],
                         preferred_element_type=jnp.float32))                 # [NF, E]
    wav_ref[...] = jnp.dot(h.astype(jnp.bfloat16), wvoc_ref[...],
                           preferred_element_type=jnp.float32)                # [NF, HOP]


# ---------------- UnitStreamer.forward (single streaming chunk) --------------
def unit_streamer_forward(x, params):
    """x: [T, F] float32 acoustic features for one chunk. Returns [OUTPUT_LEN]."""
    w_dec, b_dec, emb, w_voc = params
    x = x.astype(jnp.bfloat16)  # bf16 MXU inputs; accumulation stays f32

    cost = pl.CostEstimate(
        flops=2 * (T * F * V + 2 * T * T * V + NF * V * E + NF * E * HOP),
        transcendentals=NF * E,
        bytes_accessed=(T * F + F * V + V * E + E * HOP) * 2 + V * 4 + NF * HOP * 4,
    )

    vmem = pl.BlockSpec(memory_space=pltpu.MemorySpace.VMEM)  # whole array, no grid
    wav_frames = pl.pallas_call(
        streamer_kernel,
        out_shape=jax.ShapeDtypeStruct((NF, HOP), jnp.float32),
        in_specs=[vmem, vmem, vmem, vmem, vmem],
        out_specs=vmem,
        cost_estimate=cost,
    )(x, w_dec, b_dec, emb, w_voc)

    # push_wav_buffer + output_wav_from_buffer for one call from empty state:
    # first OUTPUT_LEN samples; frames past OUTPUT_LEN are never synthesized and
    # masked / out-of-range frames are exactly zero (== the zero padding).
    # TODO(synk): persistent wav_buffer / hypothesis carry-over across streaming
    #             calls is python-side module state and is not modeled here.
    return wav_frames.reshape(-1)[:OUTPUT_LEN]


# ---------------- deterministic parameter init --------------------------------
def init_params(key):
    k1, k2, k3, k4 = jax.random.split(key, 4)
    w_dec = (jax.random.normal(k1, (F, V), jnp.float32) * 0.1).astype(jnp.bfloat16)
    b_dec = jax.random.normal(k2, (1, V), jnp.float32) * 0.01       # bias stays f32
    emb = (jax.random.normal(k3, (V, E), jnp.float32) * 0.1).astype(jnp.bfloat16)
    w_voc = (jax.random.normal(k4, (E, HOP), jnp.float32) * 0.1).astype(jnp.bfloat16)
    return w_dec, b_dec, emb, w_voc


if __name__ == "__main__":
    key = jax.random.PRNGKey(0)
    k_x, k_p = jax.random.split(key)
    x = jax.random.normal(k_x, (T, F), jnp.float32)
    params = init_params(k_p)

    out = jax.jit(unit_streamer_forward)(x, params)
    out = jax.block_until_ready(out)
    assert out.shape == (OUTPUT_LEN,)
    assert out.dtype == jnp.float32
    print("KERNEL_OK")
</pallas_src>

<mosaic_0001>
module attributes {stable_mosaic.version = 11 : i64} {
  func.func @streamer_kernel(%arg0: memref<8x32xbf16, #tpu.memory_space<vmem>>, %arg1: memref<32x128xbf16, #tpu.memory_space<vmem>>, %arg2: memref<1x128xf32, #tpu.memory_space<vmem>>, %arg3: memref<128x32xbf16, #tpu.memory_space<vmem>>, %arg4: memref<32x128xbf16, #tpu.memory_space<vmem>>, %arg5: memref<10x128xf32, #tpu.memory_space<vmem>>) attributes {dimension_semantics = [], scalar_prefetch = 0 : i64, scratch_operands = 0 : i64, tpu.core_type = #tpu.core_type<tc>} {
    %c0 = arith.constant 0 : index
    %c0_0 = arith.constant 0 : index
    %0 = vector.load %arg0[%c0, %c0_0] : memref<8x32xbf16, #tpu.memory_space<vmem>>, vector<8x32xbf16>
    %c0_1 = arith.constant 0 : index
    %c0_2 = arith.constant 0 : index
    %1 = vector.load %arg1[%c0_1, %c0_2] : memref<32x128xbf16, #tpu.memory_space<vmem>>, vector<32x128xbf16>
    %cst = arith.constant dense<0.000000e+00> : vector<8x128xf32>
    %2 = tpu.matmul %0, %1, %cst {dimension_numbers = #tpu.dot_dimension_numbers<[1], [0], [0], [1], [0, 0, 1, 1], [], []>} : vector<8x32xbf16>, vector<32x128xbf16>, vector<8x128xf32> -> vector<8x128xf32>
    %c0_3 = arith.constant 0 : index
    %c0_4 = arith.constant 0 : index
    %3 = vector.load %arg2[%c0_3, %c0_4] : memref<1x128xf32, #tpu.memory_space<vmem>>, vector<1x128xf32>
    %4 = vector.broadcast %3 : vector<1x128xf32> to vector<8x128xf32>
    %5 = arith.addf %2, %4 : vector<8x128xf32>
    %6 = tpu.iota {dimensions = array<i32: 1>} : vector<8x128xi32>
    %cst_5 = arith.constant dense<0xFF800000> : vector<8xf32>
    %7 = vector.multi_reduction <maximumf>, %5, %cst_5 [1] : vector<8x128xf32> to vector<8xf32>
    %8 = vector.shape_cast %7 : vector<8xf32> to vector<8x1xf32>
    %9 = vector.broadcast %8 : vector<8x1xf32> to vector<8x128xf32>
    %10 = arith.cmpf oeq, %5, %9 : vector<8x128xf32>
    %c128_i32 = arith.constant 128 : i32
    %11 = vector.broadcast %c128_i32 : i32 to vector<8x128xi32>
    %12 = arith.select %10, %6, %11 : vector<8x128xi1>, vector<8x128xi32>
    %cst_6 = arith.constant dense<2147483647> : vector<8xi32>
    %13 = vector.multi_reduction <minsi>, %12, %cst_6 [1] : vector<8x128xi32> to vector<8xi32>
    %14 = vector.shape_cast %13 : vector<8xi32> to vector<8x1xi32>
    %15 = vector.shape_cast %14 : vector<8x1xi32> to vector<8x1xi32>
    %16 = vector.broadcast %15 : vector<8x1xi32> to vector<8x128xi32>
    %17 = arith.sitofp %16 : vector<8x128xi32> to vector<8x128xf32>
    %18 = vector.broadcast %14 : vector<8x1xi32> to vector<8x128xi32>
    %19 = arith.cmpi eq, %6, %18 : vector<8x128xi32>
    %20 = arith.extui %19 : vector<8x128xi1> to vector<8x128xi32>
    %21 = arith.sitofp %20 : vector<8x128xi32> to vector<8x128xf32>
    %22 = tpu.iota {dimensions = array<i32: 0>} : vector<8x8xi32>
    %23 = tpu.iota {dimensions = array<i32: 1>} : vector<8x8xi32>
    %c1_i32 = arith.constant 1 : i32
    %24 = vector.broadcast %c1_i32 : i32 to vector<8x8xi32>
    %25 = arith.subi %22, %24 : vector<8x8xi32>
    %26 = arith.cmpi eq, %23, %25 : vector<8x8xi32>
    %27 = arith.extui %26 : vector<8x8xi1> to vector<8x8xi32>
    %28 = arith.sitofp %27 : vector<8x8xi32> to vector<8x8xf32>
    %29 = arith.cmpi sle, %23, %22 : vector<8x8xi32>
    %30 = arith.extui %29 : vector<8x8xi1> to vector<8x8xi32>
    %31 = arith.sitofp %30 : vector<8x8xi32> to vector<8x8xf32>
    %32 = tpu.iota {dimensions = array<i32: 0>} : vector<8x128xi32>
    %cst_7 = arith.constant dense<0.000000e+00> : vector<8x128xf32>
    %33 = tpu.matmul %28, %17, %cst_7 {dimension_numbers = #tpu.dot_dimension_numbers<[1], [0], [0], [1], [0, 0, 1, 1], [], []>} : vector<8x8xf32>, vector<8x128xf32>, vector<8x128xf32> -> vector<8x128xf32>
    %c0_i32 = arith.constant 0 : i32
    %34 = vector.broadcast %c0_i32 : i32 to vector<8x128xi32>
    %35 = arith.cmpi eq, %32, %34 : vector<8x128xi32>
    %36 = arith.cmpf one, %17, %33 : vector<8x128xf32>
    %37 = arith.ori %35, %36 : vector<8x128xi1>
    %38 = arith.extui %37 : vector<8x128xi1> to vector<8x128xi32>
    %39 = arith.sitofp %38 : vector<8x128xi32> to vector<8x128xf32>
    %cst_8 = arith.constant dense<0.000000e+00> : vector<8x128xf32>
    %40 = tpu.matmul %31, %39, %cst_8 {dimension_numbers = #tpu.dot_dimension_numbers<[1], [0], [0], [1], [0, 0, 1, 1], [], []>} : vector<8x8xf32>, vector<8x128xf32>, vector<8x128xf32> -> vector<8x128xf32>
    %cst_9 = arith.constant 1.000000e+00 : f32
    %41 = vector.broadcast %cst_9 : f32 to vector<8x128xf32>
    %42 = arith.subf %40, %41 : vector<8x128xf32>
    %43 = tpu.iota {dimensions = array<i32: 0>} : vector<10x128xi32>
    %44 = arith.sitofp %43 : vector<10x128xi32> to vector<10x128xf32>
    %cst_10 = arith.constant 3.000000e+00 : f32
    %45 = vector.broadcast %cst_10 : f32 to vector<8x128xf32>
    %46 = arith.mulf %45, %42 : vector<8x128xf32>
    %cst_11 = arith.constant 0.000000e+00 : f32
    %47 = vector.broadcast %cst_11 : f32 to vector<10x128xf32>
    %48 = vector.extract_strided_slice %46 {offsets = [0, 0], sizes = [1, 128], strides = [1, 1]} : vector<8x128xf32> to vector<1x128xf32>
    %49 = vector.broadcast %48 : vector<1x128xf32> to vector<10x128xf32>
    %50 = arith.cmpf oge, %44, %49 : vector<10x128xf32>
    %51 = vector.extract_strided_slice %46 {offsets = [0, 0], sizes = [1, 128], strides = [1, 1]} : vector<8x128xf32> to vector<1x128xf32>
    %cst_12 = arith.constant 3.000000e+00 : f32
    %52 = vector.broadcast %cst_12 : f32 to vector<1x128xf32>
    %53 = arith.addf %51, %52 : vector<1x128xf32>
    %54 = vector.broadcast %53 : vector<1x128xf32> to vector<10x128xf32>
    %55 = arith.cmpf olt, %44, %54 : vector<10x128xf32>
    %56 = arith.andi %50, %55 : vector<10x128xi1>
    %57 = vector.extract_strided_slice %39 {offsets = [0, 0], sizes = [1, 128], strides = [1, 1]} : vector<8x128xf32> to vector<1x128xf32>
    %58 = arith.extui %56 : vector<10x128xi1> to vector<10x128xi32>
    %59 = arith.sitofp %58 : vector<10x128xi32> to vector<10x128xf32>
    %60 = vector.broadcast %57 : vector<1x128xf32> to vector<10x128xf32>
    %61 = arith.mulf %60, %59 : vector<10x128xf32>
    %62 = vector.extract_strided_slice %21 {offsets = [0, 0], sizes = [1, 128], strides = [1, 1]} : vector<8x128xf32> to vector<1x128xf32>
    %63 = vector.broadcast %62 : vector<1x128xf32> to vector<10x128xf32>
    %64 = arith.mulf %61, %63 : vector<10x128xf32>
    %65 = arith.addf %47, %64 : vector<10x128xf32>
    %66 = vector.extract_strided_slice %46 {offsets = [1, 0], sizes = [1, 128], strides = [1, 1]} : vector<8x128xf32> to vector<1x128xf32>
    %67 = vector.broadcast %66 : vector<1x128xf32> to vector<10x128xf32>
    %68 = arith.cmpf oge, %44, %67 : vector<10x128xf32>
    %69 = vector.extract_strided_slice %46 {offsets = [1, 0], sizes = [1, 128], strides = [1, 1]} : vector<8x128xf32> to vector<1x128xf32>
    %cst_13 = arith.constant 3.000000e+00 : f32
    %70 = vector.broadcast %cst_13 : f32 to vector<1x128xf32>
    %71 = arith.addf %69, %70 : vector<1x128xf32>
    %72 = vector.broadcast %71 : vector<1x128xf32> to vector<10x128xf32>
    %73 = arith.cmpf olt, %44, %72 : vector<10x128xf32>
    %74 = arith.andi %68, %73 : vector<10x128xi1>
    %75 = vector.extract_strided_slice %39 {offsets = [1, 0], sizes = [1, 128], strides = [1, 1]} : vector<8x128xf32> to vector<1x128xf32>
    %76 = arith.extui %74 : vector<10x128xi1> to vector<10x128xi32>
    %77 = arith.sitofp %76 : vector<10x128xi32> to vector<10x128xf32>
    %78 = vector.broadcast %75 : vector<1x128xf32> to vector<10x128xf32>
    %79 = arith.mulf %78, %77 : vector<10x128xf32>
    %80 = vector.extract_strided_slice %21 {offsets = [1, 0], sizes = [1, 128], strides = [1, 1]} : vector<8x128xf32> to vector<1x128xf32>
    %81 = vector.broadcast %80 : vector<1x128xf32> to vector<10x128xf32>
    %82 = arith.mulf %79, %81 : vector<10x128xf32>
    %83 = arith.addf %65, %82 : vector<10x128xf32>
    %84 = vector.extract_strided_slice %46 {offsets = [2, 0], sizes = [1, 128], strides = [1, 1]} : vector<8x128xf32> to vector<1x128xf32>
    %85 = vector.broadcast %84 : vector<1x128xf32> to vector<10x128xf32>
    %86 = arith.cmpf oge, %44, %85 : vector<10x128xf32>
    %87 = vector.extract_strided_slice %46 {offsets = [2, 0], sizes = [1, 128], strides = [1, 1]} : vector<8x128xf32> to vector<1x128xf32>
    %cst_14 = arith.constant 3.000000e+00 : f32
    %88 = vector.broadcast %cst_14 : f32 to vector<1x128xf32>
    %89 = arith.addf %87, %88 : vector<1x128xf32>
    %90 = vector.broadcast %89 : vector<1x128xf32> to vector<10x128xf32>
    %91 = arith.cmpf olt, %44, %90 : vector<10x128xf32>
    %92 = arith.andi %86, %91 : vector<10x128xi1>
    %93 = vector.extract_strided_slice %39 {offsets = [2, 0], sizes = [1, 128], strides = [1, 1]} : vector<8x128xf32> to vector<1x128xf32>
    %94 = arith.extui %92 : vector<10x128xi1> to vector<10x128xi32>
    %95 = arith.sitofp %94 : vector<10x128xi32> to vector<10x128xf32>
    %96 = vector.broadcast %93 : vector<1x128xf32> to vector<10x128xf32>
    %97 = arith.mulf %96, %95 : vector<10x128xf32>
    %98 = vector.extract_strided_slice %21 {offsets = [2, 0], sizes = [1, 128], strides = [1, 1]} : vector<8x128xf32> to vector<1x128xf32>
    %99 = vector.broadcast %98 : vector<1x128xf32> to vector<10x128xf32>
    %100 = arith.mulf %97, %99 : vector<10x128xf32>
    %101 = arith.addf %83, %100 : vector<10x128xf32>
    %102 = vector.extract_strided_slice %46 {offsets = [3, 0], sizes = [1, 128], strides = [1, 1]} : vector<8x128xf32> to vector<1x128xf32>
    %103 = vector.broadcast %102 : vector<1x128xf32> to vector<10x128xf32>
    %104 = arith.cmpf oge, %44, %103 : vector<10x128xf32>
    %105 = vector.extract_strided_slice %46 {offsets = [3, 0], sizes = [1, 128], strides = [1, 1]} : vector<8x128xf32> to vector<1x128xf32>
    %cst_15 = arith.constant 3.000000e+00 : f32
    %106 = vector.broadcast %cst_15 : f32 to vector<1x128xf32>
    %107 = arith.addf %105, %106 : vector<1x128xf32>
    %108 = vector.broadcast %107 : vector<1x128xf32> to vector<10x128xf32>
    %109 = arith.cmpf olt, %44, %108 : vector<10x128xf32>
    %110 = arith.andi %104, %109 : vector<10x128xi1>
    %111 = vector.extract_strided_slice %39 {offsets = [3, 0], sizes = [1, 128], strides = [1, 1]} : vector<8x128xf32> to vector<1x128xf32>
    %112 = arith.extui %110 : vector<10x128xi1> to vector<10x128xi32>
    %113 = arith.sitofp %112 : vector<10x128xi32> to vector<10x128xf32>
    %114 = vector.broadcast %111 : vector<1x128xf32> to vector<10x128xf32>
    %115 = arith.mulf %114, %113 : vector<10x128xf32>
    %116 = vector.extract_strided_slice %21 {offsets = [3, 0], sizes = [1, 128], strides = [1, 1]} : vector<8x128xf32> to vector<1x128xf32>
    %117 = vector.broadcast %116 : vector<1x128xf32> to vector<10x128xf32>
    %118 = arith.mulf %115, %117 : vector<10x128xf32>
    %119 = arith.addf %101, %118 : vector<10x128xf32>
    %120 = vector.extract_strided_slice %46 {offsets = [4, 0], sizes = [1, 128], strides = [1, 1]} : vector<8x128xf32> to vector<1x128xf32>
    %121 = vector.broadcast %120 : vector<1x128xf32> to vector<10x128xf32>
    %122 = arith.cmpf oge, %44, %121 : vector<10x128xf32>
    %123 = vector.extract_strided_slice %46 {offsets = [4, 0], sizes = [1, 128], strides = [1, 1]} : vector<8x128xf32> to vector<1x128xf32>
    %cst_16 = arith.constant 3.000000e+00 : f32
    %124 = vector.broadcast %cst_16 : f32 to vector<1x128xf32>
    %125 = arith.addf %123, %124 : vector<1x128xf32>
    %126 = vector.broadcast %125 : vector<1x128xf32> to vector<10x128xf32>
    %127 = arith.cmpf olt, %44, %126 : vector<10x128xf32>
    %128 = arith.andi %122, %127 : vector<10x128xi1>
    %129 = vector.extract_strided_slice %39 {offsets = [4, 0], sizes = [1, 128], strides = [1, 1]} : vector<8x128xf32> to vector<1x128xf32>
    %130 = arith.extui %128 : vector<10x128xi1> to vector<10x128xi32>
    %131 = arith.sitofp %130 : vector<10x128xi32> to vector<10x128xf32>
    %132 = vector.broadcast %129 : vector<1x128xf32> to vector<10x128xf32>
    %133 = arith.mulf %132, %131 : vector<10x128xf32>
    %134 = vector.extract_strided_slice %21 {offsets = [4, 0], sizes = [1, 128], strides = [1, 1]} : vector<8x128xf32> to vector<1x128xf32>
    %135 = vector.broadcast %134 : vector<1x128xf32> to vector<10x128xf32>
    %136 = arith.mulf %133, %135 : vector<10x128xf32>
    %137 = arith.addf %119, %136 : vector<10x128xf32>
    %138 = vector.extract_strided_slice %46 {offsets = [5, 0], sizes = [1, 128], strides = [1, 1]} : vector<8x128xf32> to vector<1x128xf32>
    %139 = vector.broadcast %138 : vector<1x128xf32> to vector<10x128xf32>
    %140 = arith.cmpf oge, %44, %139 : vector<10x128xf32>
    %141 = vector.extract_strided_slice %46 {offsets = [5, 0], sizes = [1, 128], strides = [1, 1]} : vector<8x128xf32> to vector<1x128xf32>
    %cst_17 = arith.constant 3.000000e+00 : f32
    %142 = vector.broadcast %cst_17 : f32 to vector<1x128xf32>
    %143 = arith.addf %141, %142 : vector<1x128xf32>
    %144 = vector.broadcast %143 : vector<1x128xf32> to vector<10x128xf32>
    %145 = arith.cmpf olt, %44, %144 : vector<10x128xf32>
    %146 = arith.andi %140, %145 : vector<10x128xi1>
    %147 = vector.extract_strided_slice %39 {offsets = [5, 0], sizes = [1, 128], strides = [1, 1]} : vector<8x128xf32> to vector<1x128xf32>
    %148 = arith.extui %146 : vector<10x128xi1> to vector<10x128xi32>
    %149 = arith.sitofp %148 : vector<10x128xi32> to vector<10x128xf32>
    %150 = vector.broadcast %147 : vector<1x128xf32> to vector<10x128xf32>
    %151 = arith.mulf %150, %149 : vector<10x128xf32>
    %152 = vector.extract_strided_slice %21 {offsets = [5, 0], sizes = [1, 128], strides = [1, 1]} : vector<8x128xf32> to vector<1x128xf32>
    %153 = vector.broadcast %152 : vector<1x128xf32> to vector<10x128xf32>
    %154 = arith.mulf %151, %153 : vector<10x128xf32>
    %155 = arith.addf %137, %154 : vector<10x128xf32>
    %156 = vector.extract_strided_slice %46 {offsets = [6, 0], sizes = [1, 128], strides = [1, 1]} : vector<8x128xf32> to vector<1x128xf32>
    %157 = vector.broadcast %156 : vector<1x128xf32> to vector<10x128xf32>
    %158 = arith.cmpf oge, %44, %157 : vector<10x128xf32>
    %159 = vector.extract_strided_slice %46 {offsets = [6, 0], sizes = [1, 128], strides = [1, 1]} : vector<8x128xf32> to vector<1x128xf32>
    %cst_18 = arith.constant 3.000000e+00 : f32
    %160 = vector.broadcast %cst_18 : f32 to vector<1x128xf32>
    %161 = arith.addf %159, %160 : vector<1x128xf32>
    %162 = vector.broadcast %161 : vector<1x128xf32> to vector<10x128xf32>
    %163 = arith.cmpf olt, %44, %162 : vector<10x128xf32>
    %164 = arith.andi %158, %163 : vector<10x128xi1>
    %165 = vector.extract_strided_slice %39 {offsets = [6, 0], sizes = [1, 128], strides = [1, 1]} : vector<8x128xf32> to vector<1x128xf32>
    %166 = arith.extui %164 : vector<10x128xi1> to vector<10x128xi32>
    %167 = arith.sitofp %166 : vector<10x128xi32> to vector<10x128xf32>
    %168 = vector.broadcast %165 : vector<1x128xf32> to vector<10x128xf32>
    %169 = arith.mulf %168, %167 : vector<10x128xf32>
    %170 = vector.extract_strided_slice %21 {offsets = [6, 0], sizes = [1, 128], strides = [1, 1]} : vector<8x128xf32> to vector<1x128xf32>
    %171 = vector.broadcast %170 : vector<1x128xf32> to vector<10x128xf32>
    %172 = arith.mulf %169, %171 : vector<10x128xf32>
    %173 = arith.addf %155, %172 : vector<10x128xf32>
    %174 = vector.extract_strided_slice %46 {offsets = [7, 0], sizes = [1, 128], strides = [1, 1]} : vector<8x128xf32> to vector<1x128xf32>
    %175 = vector.broadcast %174 : vector<1x128xf32> to vector<10x128xf32>
    %176 = arith.cmpf oge, %44, %175 : vector<10x128xf32>
    %177 = vector.extract_strided_slice %46 {offsets = [7, 0], sizes = [1, 128], strides = [1, 1]} : vector<8x128xf32> to vector<1x128xf32>
    %cst_19 = arith.constant 3.000000e+00 : f32
    %178 = vector.broadcast %cst_19 : f32 to vector<1x128xf32>
    %179 = arith.addf %177, %178 : vector<1x128xf32>
    %180 = vector.broadcast %179 : vector<1x128xf32> to vector<10x128xf32>
    %181 = arith.cmpf olt, %44, %180 : vector<10x128xf32>
    %182 = arith.andi %176, %181 : vector<10x128xi1>
    %183 = vector.extract_strided_slice %39 {offsets = [7, 0], sizes = [1, 128], strides = [1, 1]} : vector<8x128xf32> to vector<1x128xf32>
    %184 = arith.extui %182 : vector<10x128xi1> to vector<10x128xi32>
    %185 = arith.sitofp %184 : vector<10x128xi32> to vector<10x128xf32>
    %186 = vector.broadcast %183 : vector<1x128xf32> to vector<10x128xf32>
    %187 = arith.mulf %186, %185 : vector<10x128xf32>
    %188 = vector.extract_strided_slice %21 {offsets = [7, 0], sizes = [1, 128], strides = [1, 1]} : vector<8x128xf32> to vector<1x128xf32>
    %189 = vector.broadcast %188 : vector<1x128xf32> to vector<10x128xf32>
    %190 = arith.mulf %187, %189 : vector<10x128xf32>
    %191 = arith.addf %173, %190 : vector<10x128xf32>
    %192 = arith.truncf %191 : vector<10x128xf32> to vector<10x128xbf16>
    %c0_20 = arith.constant 0 : index
    %c0_21 = arith.constant 0 : index
    %193 = vector.load %arg3[%c0_20, %c0_21] : memref<128x32xbf16, #tpu.memory_space<vmem>>, vector<128x32xbf16>
    %cst_22 = arith.constant dense<0.000000e+00> : vector<10x32xf32>
    %194 = tpu.matmul %192, %193, %cst_22 {dimension_numbers = #tpu.dot_dimension_numbers<[1], [0], [0], [1], [0, 0, 1, 1], [], []>} : vector<10x128xbf16>, vector<128x32xbf16>, vector<10x32xf32> -> vector<10x32xf32>
    %195 = math.tanh %194 : vector<10x32xf32>
    %196 = arith.truncf %195 : vector<10x32xf32> to vector<10x32xbf16>
    %c0_23 = arith.constant 0 : index
    %c0_24 = arith.constant 0 : index
    %197 = vector.load %arg4[%c0_23, %c0_24] : memref<32x128xbf16, #tpu.memory_space<vmem>>, vector<32x128xbf16>
    %cst_25 = arith.constant dense<0.000000e+00> : vector<10x128xf32>
    %198 = tpu.matmul %196, %197, %cst_25 {dimension_numbers = #tpu.dot_dimension_numbers<[1], [0], [0], [1], [0, 0, 1, 1], [], []>} : vector<10x32xbf16>, vector<32x128xbf16>, vector<10x128xf32> -> vector<10x128xf32>
    %c0_26 = arith.constant 0 : index
    %c0_27 = arith.constant 0 : index
    %199 = vector.load %arg5[%c0_26, %c0_27] : memref<10x128xf32, #tpu.memory_space<vmem>>, vector<10x128xf32>
    tpu.vector_store %arg5[%c0_26, %c0_27], %198 {strides = array<i32>} : memref<10x128xf32, #tpu.memory_space<vmem>>, vector<10x128xf32>,
    return
  }
}

</mosaic_0001>

<bundles_post_ra>
// kernel: unit_streamer_forward.1
= control target key start
LH: loop header
LB: loop body
LE: loop exit
PB: predicated region body
PF: predicated region fallthrough
CT: control target
= control target key end

     0   :  { %v873_v1 = vmov 0.0   ;;  %vm874_vm0 = vmmov 0   ;;  %vm1199_vm1 = vcmask 261120   ;;  %s1193_s0 = inlined_call_operand.vmem [shape: bf16[8,32], index: 0, kind: input, shape index: {}]   ;;  %s1194_s1 = inlined_call_operand.vmem [shape: bf16[32,128], index: 1, kind: input, shape index: {}]   ;;  %s1195_s2 = inlined_call_operand.vmem [shape: f32[1,128], index: 2, kind: input, shape index: {}]   ;;  %s1196_s3 = inlined_call_operand.vmem [shape: bf16[128,32], index: 3, kind: input, shape index: {}]   ;;  %s1197_s4 = inlined_call_operand.vmem [shape: bf16[32,128], index: 4, kind: input, shape index: {}]   ;;  %s1198_s5 = inlined_call_operand.hbm [shape: f32[10,128], index: 5, kind: output, shape index: {}]  }
   0x1   :  { %v835_v0 = vld [vmem:[%s1194_s1 + $0x8] sm:$0xff]   ;;  %783 = vmatprep.subr.bf16.mxu0 %v873_v1  ;;  %801 = vmatprep.subr.bf16.mxu1 %v873_v1  ;;  %v836_v2 = vld [vmem:[%s1194_s1] sm:$0xff]  }
   0x2   :  { %784 = vmatpush3.bf16.msra.mxu0 %v835_v0  ;;  %787 = vmatprep.mubr.msk.bf16.mxu0 %vm874_vm0, %v873_v1  ;;  %v22_v3 = vld [vmem:[%s1193_s0] sm:$0xf] }
   0x3   :  { %785 = vmatprep.subr.bf16.mxu0 %v873_v1  ;;  %817 = vmatprep.mubr.msk.bf16.mxu1 %vm874_vm0, %v873_v1 }
   0x6   :  { %786 = vmatpush3.bf16.msra.mxu0 %v836_v2 }
   0x7   :  { %791 = vmatprep.subr.mxu0 %v873_v1 }
   0x9   :  { %788 = vmatmul.mubr.msk.bf16.vlgmr.msra.gmra.mxu0 %vm1199_vm1, %v22_v3 }
   0xa   :  { %10 = vsyncpa [#allocation3], 0  ;;  %793 = vmatprep.mubr.msk.f32.mxu0 %vm874_vm0, %v873_v1  ;;  %v724_v4 = vld [vmem:[%s1195_s2] ss:$0 sm:$0xff]  ;;  %v90_v10 = vlaneseq  ;;  %vm123_vm5 = vcmask 64512   ;;  %v875_v33 = vmov 1.0  }
   0xb   :  { %v837_v34 = vld [vmem:[%s1196_s3 + $0x38] sm:$0xff]   ;;  %v838_v35 = vld [vmem:[%s1196_s3 + $0x30] sm:$0xff]   ;;  %v839_v36 = vld [vmem:[%s1196_s3 + $0x28] sm:$0xff]   ;;  %s876_s17 = smov [#allocation2]  }
   0xc   :  { %v932_v11 = vand.u32 127, %v90_v10  ;;  %v935_v20 = vshrl.u32 %v90_v10, 7  ;;  %802 = vmatpush3.bf16.msra.mxu1 %v837_v34  ;;  %v840_v37 = vld [vmem:[%s1196_s3 + $0x20] sm:$0xff]   ;;  %v841_v38 = vld [vmem:[%s1196_s3 + $0x18] sm:$0xff]   ;;  %v842_v39 = vld [vmem:[%s1196_s3 + $0x10] sm:$0xff]   ;;  %s713_s18 = sshll.u32 %s876_s17, 4  ;;  %s714_s18 = int_to_ptr.vmem [resolvable:$true] %s713_s18 }
   0xd   :  { %803 = vmatprep.subr.bf16.mxu1 %v873_v1  ;;  %v843_v40 = vld [vmem:[%s1196_s3 + $0x8] sm:$0xff]   ;;  %v844_v41 = vld [vmem:[%s1196_s3] sm:$0xff]   ;;  %p856_p1 = scmp.lt.s32.totalorder %s714_s18, %s714_s18 }
   0xe   :  { %v729_v22 = vadd.s32 4294967295, %v935_v20  ;;  %vm120_vm6 = vcmp.le.s32.totalorder %v932_v11, %v935_v20  ;;  %vm197_vm7 = vcmp.eq.s32.totalorder %v935_v20, 0  ;;  %v276_v42 = vadd.s32 8, %v935_v20 }
   0xf   :  { %v731_v30 = vsel %vm120_vm6, 1.0, %v873_v1  ;;  %v282_v43 = vsub.s32 0, %v935_v20  ;;  %v315_v44 = vsub.s32 1, %v935_v20  ;;  %v347_v45 = vsub.s32 2, %v935_v20 }
  0x10   :  { %vm117_vm4 = vcmp.eq.s32.totalorder %v932_v11, %v729_v22  ;;  %804 = vmatpush3.bf16.msra.mxu1 %v838_v35  ;;  %v379_v46 = vsub.s32 3, %v935_v20  ;;  %v411_v48 = vsub.s32 4, %v935_v20  ;;  %v998_v49 = vsub.s32 5, %v935_v20 }
  0x11   :  { %v730_v28 = vsel %vm117_vm4, 1.0, %v873_v1  ;;  %805 = vmatprep.subr.bf16.mxu1 %v873_v1  ;;  %v1001_v50 = vsub.s32 6, %v935_v20  ;;  %v1004_v51 = vcvt.s32.f32 %v935_v20  ;;  %v1006_v53 = vcvt.s32.f32 %v276_v42 }
  0x12   :  { %v1014_v56 = vsub.s32 7, %v935_v20 }
  0x14   :  { %806 = vmatpush3.bf16.msra.mxu1 %v839_v36 }
  0x15   :  { %807 = vmatprep.subr.bf16.mxu1 %v873_v1 }
  0x18   :  { %808 = vmatpush3.bf16.msra.mxu1 %v840_v37 }
  0x19   :  { %809 = vmatprep.subr.bf16.mxu1 %v873_v1 }
  0x1c   :  { %810 = vmatpush3.bf16.msra.mxu1 %v841_v38 }
  0x1d   :  { %811 = vmatprep.subr.bf16.mxu1 %v873_v1 }
  0x20   :  { %812 = vmatpush3.bf16.msra.mxu1 %v842_v39 }
  0x21   :  { %813 = vmatprep.subr.bf16.mxu1 %v873_v1 }
  0x24   :  { %814 = vmatpush3.bf16.msra.mxu1 %v843_v40 }
  0x25   :  { %815 = vmatprep.subr.bf16.mxu1 %v873_v1 }
  0x28   :  { %816 = vmatpush3.bf16.msra.mxu1 %v844_v41 }
  0xc9   :  { %v84_v5 = vpop.f32.mrf.mxu0 }
  0xca   :  { %v85_v6 = vadd.f32 %v724_v4, %v84_v5 }
  0xcb   :  { %v789_v7 = vpop.f32.mrf.mxu0 }
  0xcc   :  { %92 = vmax.xlane.f32.xlu0 %v85_v6 }
  0xcd   :  { %v87_v8 = vpop.f32.mrf.mxu0 }
  0xcf   :  { %v790_v9 = vpop.f32.mrf.mxu0 }
 0x155   :  { %v93_v12 = vpop.xlane.xlu0 %92 }
 0x156   :  { %vm94_vm2 = vcmp.eq.f32.partialorder %v85_v6, %v93_v12 }
 0x157   :  { %v95_v13 = vsel %vm94_vm2, %v932_v11, 128 }
 0x158   :  { %v97_v14 = vshra.s32 %v95_v13, 16  ;;  %v96_v16 = vand.u32 65535, %v95_v13 }
 0x15a   :  { %v99_v15 = vcvt.s32.f32 %v97_v14  ;;  %v98_v18 = vcvt.s32.f32 %v96_v16 }
 0x15c   :  { %100 = vmin.xlane.f32.xlu0 %v99_v15 }
 0x1e5   :  { %v101_v17 = vpop.xlane.xlu0 %100 }
 0x1e6   :  { %vm102_vm3 = vcmp.eq.f32.partialorder %v99_v15, %v101_v17  ;;  %v107_v21 = vcvt.f32.s32 %v101_v17 }
 0x1e7   :  { %v103_v19 = vsel %vm102_vm3, %v98_v18, inf }
 0x1e8   :  { %104 = vmin.xlane.f32.xlu1 %v103_v19  ;;  %v108_v24 = vshll.u32 %v107_v21, 16 }
 0x271   :  { %v105_v23 = vpop.xlane.xlu1 %104 }
 0x272   :  { %v106_v25 = vcvt.f32.s32 %v105_v23 }
 0x274   :  { %v109_v26 = vadd.s32 %v108_v24, %v106_v25 }
 0x276   :  { %v110_v27 = vcvt.s32.f32 %v109_v26  ;;  %vm111_vm10 = vcmp.eq.s32.totalorder %v932_v11, %v109_v26 }
 0x277   :  { %v994_v47 = vsel %vm111_vm10, 1.0, %v873_v1 }
 0x278   :  { %792 = vmatpush3.msra.mxu0 %v110_v27  ;;  %v308_v57 = vrot.slane %v994_v47, %v282_v43  ;;  %v1018_v58 = vrot.slane %v994_v47, %v315_v44  ;;  %v1021_v60 = vrot.slane %v994_v47, %v347_v45  ;;  %v1024_v61 = vrot.slane %v994_v47, %v379_v46 }
 0x279   :  { %794 = vmatmul.mubr.msk.f32.vlgmr.msra.gmra.mxu0 %vm123_vm5, %v730_v28  ;;  %796 = vmatprep.subr.mxu0 %v873_v1  ;;  %v1029_v63 = vrot.slane %v994_v47, %v411_v48  ;;  %v1033_v0 = vrot.slane %v994_v47, %v998_v49  ;;  %v1037_v2 = vrot.slane %v994_v47, %v1001_v50 }
 0x27a   :  { %798 = vmatprep.mubr.msk.f32.mxu0 %vm874_vm0, %v873_v1 }
 0x339   :  { %v193_v29 = vpop.f32.mrf.mxu0 }
 0x33a   :  { %vm198_vm8 = vcmp.ne.f32.partialorder %v110_v27, %v193_v29 }
 0x33b   :  { %vm947_vm9 = vmor %vm197_vm7, %vm198_vm8  ;;  %v795_v32 = vpop.f32.mrf.mxu0 }
 0x33c   :  { %797 = vmatpush3.msk.msra.mxu0 %vm947_vm9, %v875_v33  ;;  %v1011_v54 = vsel %vm947_vm9, 1.0, %v873_v1 }
 0x33d   :  { %799 = vmatmul.mubr.msk.f32.vlgmr.msra.gmra.mxu0 %vm123_vm5, %v731_v30  ;;  %821 = vmatprep.subr.bf16.mxu0 %v873_v1  ;;  %v302_v3 = vrot.slane %v1011_v54, %v282_v43  ;;  %v334_v4 = vrot.slane %v1011_v54, %v315_v44  ;;  %v366_v5 = vrot.slane %v1011_v54, %v347_v45 }
 0x33e   :  { %825 = vmatprep.mubr.msk.bf16.mxu0 %vm874_vm0, %v873_v1  ;;  %v1043_v6 = vrot.slane %v1011_v54, %v379_v46  ;;  %v1056_v13 = vrot.slane %v1011_v54, %v411_v48  ;;  %v1060_v14 = vrot.slane %v1011_v54, %v998_v49 }
 0x3fd   :  { %v271_v52 = vpop.f32.mrf.mxu0 }
 0x3fe   :  { %v736_v55 = vadd.f32 -1.0, %v271_v52 }
 0x3ff   :  { %v800_v59 = vpop.f32.mrf.mxu0 }
 0x400   :  { %v1026_v62 = vmul.f32 3.0, %v736_v55 }
 0x402   :  { %v1046_v7 = vadd.f32 3.0, %v1026_v62  ;;  %v283_v8 = vrot.slane %v1026_v62, %v282_v43  ;;  %v316_v9 = vrot.slane %v1026_v62, %v315_v44  ;;  %v348_v10 = vrot.slane %v1026_v62, %v347_v45 }
 0x403   :  { %v380_v11 = vrot.slane %v1026_v62, %v379_v46  ;;  %v1053_v12 = vrot.slane %v1026_v62, %v411_v48  ;;  %v1066_v16 = vrot.slane %v1026_v62, %v998_v49  ;;  %v1070_v17 = vrot.slane %v1026_v62, %v1001_v50 }
 0x404   :  { %vm284_vm11 = vcmp.ge.f32.partialorder %v1004_v51, %v283_v8  ;;  %v290_v15 = vrot.slane %v1046_v7, %v282_v43  ;;  %vm285_vm12 = vcmp.ge.f32.partialorder %v1006_v53, %v283_v8  ;;  %vm317_vm13 = vcmp.ge.f32.partialorder %v1004_v51, %v316_v9 }
 0x405   :  { %vm318_vm14 = vcmp.ge.f32.partialorder %v1006_v53, %v316_v9  ;;  %v322_v18 = vrot.slane %v1046_v7, %v315_v44  ;;  %vm349_vm2 = vcmp.ge.f32.partialorder %v1004_v51, %v348_v10  ;;  %v354_v19 = vrot.slane %v1046_v7, %v347_v45 }
 0x406   :  { %vm291_vm15 = vcmp.lt.f32.partialorder %v1004_v51, %v290_v15  ;;  %vm292_vm0 = vcmp.lt.f32.partialorder %v1006_v53, %v290_v15  ;;  %vm350_vm6 = vcmp.ge.f32.partialorder %v1006_v53, %v348_v10  ;;  %v386_v20 = vrot.slane %v1046_v7, %v379_v46 }
 0x407   :  { %vm293_vm3 = vmand %vm284_vm11, %vm291_vm15  ;;  %vm323_vm4 = vcmp.lt.f32.partialorder %v1004_v51, %v322_v18  ;;  %vm324_vm5 = vcmp.lt.f32.partialorder %v1006_v53, %v322_v18  ;;  %vm355_vm8 = vcmp.lt.f32.partialorder %v1004_v51, %v354_v19  ;;  %vm381_vm9 = vcmp.ge.f32.partialorder %v1004_v51, %v380_v11 }
 0x408   :  { %vm294_vm7 = vmand %vm285_vm12, %vm292_vm0  ;;  %v737_v21 = vsel %vm293_vm3, 1.0, %v873_v1  ;;  %vm382_vm10 = vcmp.ge.f32.partialorder %v1006_v53, %v380_v11  ;;  %vm356_vm15 = vcmp.lt.f32.partialorder %v1006_v53, %v354_v19  ;;  %vm413_vm1 = vcmp.ge.f32.partialorder %v1004_v51, %v1053_v12 }
 0x409   :  { %v738_v22 = vsel %vm294_vm7, 1.0, %v873_v1  ;;  %v303_v23 = vmul.f32 %v737_v21, %v302_v3  ;;  %vm325_vm11 = vmand %vm317_vm13, %vm323_vm4  ;;  %vm387_vm0 = vcmp.lt.f32.partialorder %v1004_v51, %v386_v20  ;;  %v418_v26 = vrot.slane %v1046_v7, %v411_v48 }
 0x40a   :  { %v304_v24 = vmul.f32 %v738_v22, %v302_v3  ;;  %vm326_vm12 = vmand %vm318_vm14, %vm324_vm5  ;;  %v739_v25 = vsel %vm325_vm11, 1.0, %v873_v1  ;;  %vm388_vm3 = vcmp.lt.f32.partialorder %v1006_v53, %v386_v20  ;;  %vm414_vm7 = vcmp.ge.f32.partialorder %v1006_v53, %v1053_v12 }
 0x40b   :  { %v309_v27 = vmul.f32 %v308_v57, %v303_v23  ;;  %v740_v28 = vsel %vm326_vm12, 1.0, %v873_v1  ;;  %v335_v29 = vmul.f32 %v739_v25, %v334_v4  ;;  %vm357_vm13 = vmand %vm349_vm2, %vm355_vm8  ;;  %vm419_vm4 = vcmp.lt.f32.partialorder %v1004_v51, %v418_v26 }
 0x40c   :  { %v310_v30 = vmul.f32 %v308_v57, %v304_v24  ;;  %v336_v31 = vmul.f32 %v740_v28, %v334_v4  ;;  %vm358_vm14 = vmand %vm350_vm6, %vm356_vm15  ;;  %v741_v32 = vsel %vm357_vm13, 1.0, %v873_v1  ;;  %vm420_vm5 = vcmp.lt.f32.partialorder %v1006_v53, %v418_v26 }
 0x40d   :  { %v341_v33 = vmul.f32 %v1018_v58, %v335_v29  ;;  %v742_v34 = vsel %vm358_vm14, 1.0, %v873_v1  ;;  %v367_v35 = vmul.f32 %v741_v32, %v366_v5  ;;  %vm389_vm2 = vmand %vm381_vm9, %vm387_vm0  ;;  %v508_v9 = vrot.slane %v1026_v62, %v1014_v56 }
 0x40e   :  { %v342_v36 = vmul.f32 %v1018_v58, %v336_v31  ;;  %v368_v37 = vmul.f32 %v742_v34, %v366_v5  ;;  %vm390_vm6 = vmand %vm382_vm10, %vm388_vm3  ;;  %v743_v38 = vsel %vm389_vm2, 1.0, %v873_v1  ;;  %vm446_vm10 = vcmp.ge.f32.partialorder %v1006_v53, %v1066_v16 }
 0x40f   :  { %v343_v39 = vadd.f32 %v341_v33, %v309_v27  ;;  %v373_v40 = vmul.f32 %v1021_v60, %v367_v35  ;;  %v744_v41 = vsel %vm390_vm6, 1.0, %v873_v1  ;;  %v399_v42 = vmul.f32 %v743_v38, %v1043_v6  ;;  %vm421_vm8 = vmand %vm413_vm1, %vm419_vm4 }
 0x410   :  { %v344_v43 = vadd.f32 %v342_v36, %v310_v30  ;;  %v374_v44 = vmul.f32 %v1021_v60, %v368_v37  ;;  %v400_v45 = vmul.f32 %v744_v41, %v1043_v6  ;;  %vm422_vm9 = vmand %vm414_vm7, %vm420_vm5  ;;  %v745_v46 = vsel %vm421_vm8, 1.0, %v873_v1 }
 0x411   :  { %v375_v48 = vadd.f32 %v373_v40, %v343_v39  ;;  %v405_v52 = vmul.f32 %v1024_v61, %v399_v42  ;;  %v746_v55 = vsel %vm422_vm9, 1.0, %v873_v1  ;;  %v431_v57 = vmul.f32 %v745_v46, %v1056_v13 }
 0x412   :  { %v376_v58 = vadd.f32 %v374_v44, %v344_v43  ;;  %v406_v59 = vmul.f32 %v1024_v61, %v400_v45  ;;  %v432_v3 = vmul.f32 %v746_v55, %v1056_v13  ;;  %v450_v60 = vrot.slane %v1046_v7, %v998_v49 }
 0x413   :  { %v407_v4 = vadd.f32 %v405_v52, %v375_v48  ;;  %v437_v5 = vmul.f32 %v1029_v63, %v431_v57  ;;  %vm445_vm1 = vcmp.ge.f32.partialorder %v1004_v51, %v1066_v16  ;;  %v482_v49 = vrot.slane %v1046_v7, %v1001_v50 }
 0x414   :  { %v408_v6 = vadd.f32 %v406_v59, %v376_v58  ;;  %v438_v8 = vmul.f32 %v1029_v63, %v432_v3  ;;  %vm451_vm11 = vcmp.lt.f32.partialorder %v1004_v51, %v450_v60  ;;  %vm452_vm15 = vcmp.lt.f32.partialorder %v1006_v53, %v450_v60 }
 0x415   :  { %v439_v61 = vadd.f32 %v437_v5, %v407_v4  ;;  %vm453_vm12 = vmand %vm445_vm1, %vm451_vm11  ;;  %v514_v10 = vrot.slane %v1046_v7, %v1014_v56  ;;  %vm477_vm13 = vcmp.ge.f32.partialorder %v1004_v51, %v1070_v17  ;;  %v494_v63 = vrot.slane %v1011_v54, %v1001_v50 }
 0x416   :  { %v440_v11 = vadd.f32 %v438_v8, %v408_v6  ;;  %vm454_vm0 = vmand %vm446_vm10, %vm452_vm15  ;;  %v747_v12 = vsel %vm453_vm12, 1.0, %v873_v1  ;;  %vm483_vm3 = vcmp.lt.f32.partialorder %v1004_v51, %v482_v49  ;;  %vm484_vm14 = vcmp.lt.f32.partialorder %v1006_v53, %v482_v49 }
 0x417   :  { %v748_v13 = vsel %vm454_vm0, 1.0, %v873_v1  ;;  %v463_v15 = vmul.f32 %v747_v12, %v1060_v14  ;;  %vm478_vm4 = vcmp.ge.f32.partialorder %v1006_v53, %v1070_v17  ;;  %vm485_vm2 = vmand %vm477_vm13, %vm483_vm3  ;;  %vm515_vm5 = vcmp.lt.f32.partialorder %v1004_v51, %v514_v10 }
 0x418   :  { %v464_v62 = vmul.f32 %v748_v13, %v1060_v14  ;;  %v526_v7 = vrot.slane %v1011_v54, %v1014_v56  ;;  %vm486_vm6 = vmand %vm478_vm4, %vm484_vm14  ;;  %v749_v16 = vsel %vm485_vm2, 1.0, %v873_v1  ;;  %vm509_vm7 = vcmp.ge.f32.partialorder %v1004_v51, %v508_v9 }
 0x419   :  { %v469_v50 = vmul.f32 %v1033_v0, %v463_v15  ;;  %vm516_vm8 = vcmp.lt.f32.partialorder %v1006_v53, %v514_v10  ;;  %v750_v18 = vsel %vm486_vm6, 1.0, %v873_v1  ;;  %v495_v17 = vmul.f32 %v749_v16, %v494_v63  ;;  %vm517_vm1 = vmand %vm509_vm7, %vm515_vm5 }
 0x41a   :  { %v470_v14 = vmul.f32 %v1033_v0, %v464_v62  ;;  %vm510_vm9 = vcmp.ge.f32.partialorder %v1006_v53, %v508_v9  ;;  %v496_v20 = vmul.f32 %v750_v18, %v494_v63  ;;  %v751_v54 = vsel %vm517_vm1, 1.0, %v873_v1 }
 0x41b   :  { %v471_v19 = vadd.f32 %v469_v50, %v439_v61  ;;  %vm518_vm10 = vmand %vm510_vm9, %vm516_vm8  ;;  %v532_v21 = vrot.slane %v994_v47, %v1014_v56  ;;  %v501_v51 = vmul.f32 %v1037_v2, %v495_v17  ;;  %v527_v0 = vmul.f32 %v751_v54, %v526_v7  ;;  %v845_v47 = vld [vmem:[%s1197_s4 + $0x8] sm:$0xff]   ;;  %v846_v56 = vld [vmem:[%s1197_s4] sm:$0xff]   ;;  %s851_s4 = scalar_lea.vmem %s714_s18, 256 }
 0x41c   :  { %v472_v22 = vadd.f32 %v470_v14, %v440_v11  ;;  %v752_v23 = vsel %vm518_vm10, 1.0, %v873_v1  ;;  %v502_v24 = vmul.f32 %v1037_v2, %v496_v20  ;;  %822 = vmatpush3.bf16.msra.mxu0 %v845_v47  ;;  %vm1202_vm11 = vcmask 261120   ;;  %p852_p0 = scmp.ne.s32.totalorder %s714_s18, %s851_s4  ;;  %p857_p2 = scmp.lt.s32.totalorder %s851_s4, %s851_s4 }
 0x41d   :  { %v528_v25 = vmul.f32 %v752_v23, %v526_v7  ;;  %v503_v26 = vadd.f32 %v501_v51, %v471_v19  ;;  %v533_v53 = vmul.f32 %v532_v21, %v527_v0  ;;  %823 = vmatprep.subr.bf16.mxu0 %v873_v1 }
 0x41e   :  { %v504_v27 = vadd.f32 %v502_v24, %v472_v22  ;;  %p858_p3 = por %p857_p2, %p856_p1 }
 0x41f   :  { %v534_v28 = vmul.f32 %v532_v21, %v528_v25  ;;  %v535_v29 = vadd.f32 %v533_v53, %v503_v26 }
 0x420   :  { %824 = vmatpush3.bf16.msra.mxu0 %v846_v56  ;;  %p859_p4 = pnand %p858_p3, %p852_p0 }
 0x421   :  { %v536_v30 = vadd.f32 %v534_v28, %v504_v27 }
 0x423   :  { %v537_v31 = vpack.c.bf16 %v536_v30, %v535_v29 }
 0x425   :  { %818 = vmatmul.mubr.bf16.vlgmr.msra.gmra.mxu1 %v537_v31 }
 0x4e5   :  { %v636_v2 = vpop.f32.mrf.mxu1 }
 0x4e6   :  { %847 = vtanh.f32 %v636_v2 }
 0x4e7   :  { %v819_v32 = vpop.f32.mrf.mxu1 }
 0x4e9   :  { %v639_v33 = vpop.f32.mrf.mxu1 }
 0x4ea   :  { %849 = vtanh.f32 %v639_v33 }
 0x4eb   :  { %v820_v34 = vpop.f32.mrf.mxu1 }
 0x4f3   :  { %v848_v35 = vpop.eup %847 }
 0x4f7   :  { %v850_v36 = vpop.eup %849 }
 0x4f8   :  { %v645_v37 = vpack.c.bf16 %v850_v36, %v848_v35 }
 0x4fa   :  { %826 = vmatmul.mubr.msk.bf16.vlgmr.msra.gmra.mxu0 %vm1202_vm11, %v645_v37 }
 0x5ba   :  { %v699_v38 = vpop.f32.mrf.mxu0 }
 0x5bb   :  { %706 = vst [vmem:[#allocation2] sm:$0xff] %v699_v38 }
 0x5bc   :  { %v827_v39 = vpop.f32.mrf.mxu0 }
 0x5be   :  { %v702_v40 = vpop.f32.mrf.mxu0 }
 0x5bf   :  { %707 = vst [vmem:[#allocation2 + $0x8] sm:$0x3] %v702_v40 }
 0x5c0   :  { %v828_v1 = vpop.f32.mrf.mxu0 }
 0x5c1   :  { %862 = shalt.err (!%p859_p4)
}
 0x5c2   :  { %s877_s19 = smov 128   ;;  %s878_s20 = smov 8  }
 0x5c3   :  { %719 = dma.vmem_to_hbm [thread:$0]  %s714_s18, 256, %s1198_s5, [#allocation3], %s877_s19, %s877_s19, %s878_s20  }
 0x5c4   :  { %871 = dma.done.wait [#allocation3], 256  }
 0x5c5   :  { %872 = vsyncadd [#allocation3], 4294967040 }
 0x5c6   :  { %723 = vsyncpa [#allocation3], 1 }

</bundles_post_ra>
